<compile_context>
chip_gen: v7x
topology: tpu7x:2x2x1
jax: 0.10.0
libtpu: 0.0.40
codegen_flags: <defaults>
</compile_context>

<pallas_src>
import math
from functools import partial

import jax
import jax.numpy as jnp
import numpy as np
from jax.experimental import pallas as pl
from jax.experimental.pallas import tpu as pltpu


def _round_up(x, m):
    return ((x + m - 1) // m) * m


# ----------------------------------------------------------------------------- kernel
def _twin_kernel(state_ref, action_ref, w_ref, b_ref, out_ref, *,
                 sdim, adim, hp, npad, o_w1s, o_w1a, o_w2, o_w3):
    """state_ref: (BB, sdim) f32; action_ref: (BB, adim) f32;
    w_ref: (R, W) bf16 packed weights; b_ref: (8, W) f32 packed biases;
    out_ref: (BB, npad) f32 lane-dense slab."""
    s = state_ref[...].astype(jnp.bfloat16)
    a = action_ref[...].astype(jnp.bfloat16)

    # layer 1: relu(state@W1s + action@W1a + b1)   (bf16 operands, f32 accum)
    h = jnp.dot(s, w_ref[o_w1s:o_w1s + sdim, :hp],
                preferred_element_type=jnp.float32)
    h = h + jnp.dot(a, w_ref[o_w1a:o_w1a + adim, :hp],
                    preferred_element_type=jnp.float32)
    h = jnp.maximum(h + b_ref[0:1, :hp], 0.0)

    # layer 2: block-diagonal [2H, 2H] (both heads in one lane-dense matmul)
    h = jnp.dot(h.astype(jnp.bfloat16), w_ref[o_w2:o_w2 + hp, :hp],
                preferred_element_type=jnp.float32)
    h = jnp.maximum(h + b_ref[1:2, :hp], 0.0)

    # layer 3: block-structured [2H, 2C], no activation; unmasked lane-dense store
    o = jnp.dot(h.astype(jnp.bfloat16), w_ref[o_w3:o_w3 + hp, :npad],
                preferred_element_type=jnp.float32)
    out_ref[...] = o + b_ref[2:3, :npad]


# ----------------------------------------------------------------------------- packing
def pack_twin_params(q1_params, q2_params, state_dim, action_dim, hidden, nclass):
    """Pack both heads into one bf16 weight buffer + one tiny f32 bias buffer.

    Weight layout (every segment starts on a 16-row bf16 sublane-tile boundary):
      w1s : [state_dim,  2H]   layer-1 rows fed by `state`
      w1a : [action_dim, 2H]   layer-1 rows fed by `action`
      w2  : [2H, 2H]           block-diagonal (q1 top-left, q2 bottom-right)
      w3  : [2H, 2C]           block-structured
    Bias buffer rows: 0 = b1 (2H lanes), 1 = b2 (2H lanes), 2 = b3 (2C lanes).
    Hidden/output widths zero-padded to multiples of 128 lanes.
    """
    assert 2 * hidden <= 128, (
        "head-folded packing is only lane-dense/optimal for 2*hidden <= 128; "
        "use per-head matmuls for larger hidden_dim")  # perf-review guard [7]
    hp = _round_up(2 * hidden, 128)
    npad = _round_up(2 * nclass, 128)
    wcols = max(hp, npad)

    offs, row = {}, 0

    def alloc(name, nrows):
        nonlocal row
        offs[name] = row
        row += _round_up(nrows, 16)          # bf16 sublane-tile alignment

    alloc("w1s", state_dim)
    alloc("w1a", action_dim)
    alloc("w2", hp)
    alloc("w3", hp)
    total_rows = _round_up(row, 16)

    wbuf = np.zeros((total_rows, wcols), np.float32)
    bbuf = np.zeros((8, wcols), np.float32)

    w1a_, b1a, w2a, b2a, w3a, b3a = [np.asarray(t, np.float32) for t in q1_params]
    w1b_, b1b, w2b, b2b, w3b, b3b = [np.asarray(t, np.float32) for t in q2_params]
    H, C, S, A = hidden, nclass, state_dim, action_dim

    # layer 1 (split rows state/action, columns concatenated q1|q2)
    wbuf[offs["w1s"]:offs["w1s"] + S, 0:H] = w1a_[:S]
    wbuf[offs["w1s"]:offs["w1s"] + S, H:2 * H] = w1b_[:S]
    wbuf[offs["w1a"]:offs["w1a"] + A, 0:H] = w1a_[S:]
    wbuf[offs["w1a"]:offs["w1a"] + A, H:2 * H] = w1b_[S:]
    # layer 2 block-diagonal
    wbuf[offs["w2"]:offs["w2"] + H, 0:H] = w2a
    wbuf[offs["w2"] + H:offs["w2"] + 2 * H, H:2 * H] = w2b
    # layer 3 block-structured
    wbuf[offs["w3"]:offs["w3"] + H, 0:C] = w3a
    wbuf[offs["w3"] + H:offs["w3"] + 2 * H, C:2 * C] = w3b
    # biases (f32, one row each)
    bbuf[0, 0:H] = b1a; bbuf[0, H:2 * H] = b1b
    bbuf[1, 0:H] = b2a; bbuf[1, H:2 * H] = b2b
    bbuf[2, 0:C] = b3a; bbuf[2, C:2 * C] = b3b

    return (jnp.asarray(wbuf, jnp.bfloat16), jnp.asarray(bbuf, jnp.float32),
            offs, hp, npad)


# ----------------------------------------------------------------------------- wrappers
def mlp_critic_twin_forward_slab(state, action, wpacked, bpacked, offs, *,
                                 hp, npad, block_b=128):
    """Returns the lane-dense (B, npad) f32 slab; q1 = cols [0:C], q2 = [C:2C]."""
    B, sdim = state.shape
    _, adim = action.shape
    rw, wcols = wpacked.shape
    bb = B if B <= block_b else block_b          # full-batch block for small B
    grid = (pl.cdiv(B, bb),)

    kernel = partial(_twin_kernel, sdim=sdim, adim=adim, hp=hp, npad=npad,
                     o_w1s=offs["w1s"], o_w1a=offs["w1a"],
                     o_w2=offs["w2"], o_w3=offs["w3"])

    flops = 2 * B * (sdim * hp + adim * hp + hp * hp + hp * npad)
    bytes_accessed = int(state.size * 4 + action.size * 4
                         + wpacked.size * 2 + bpacked.size * 4 + B * npad * 4)

    return pl.pallas_call(
        kernel,
        out_shape=jax.ShapeDtypeStruct((B, npad), jnp.float32),
        grid=grid,
        in_specs=[
            pl.BlockSpec((bb, sdim), lambda i: (i, 0)),     # state, per batch block
            pl.BlockSpec((bb, adim), lambda i: (i, 0)),     # action, per batch block
            pl.BlockSpec((rw, wcols), lambda i: (0, 0)),    # weights: fetched once, resident
            pl.BlockSpec((8, wcols), lambda i: (0, 0)),     # biases: fetched once, resident
        ],
        out_specs=pl.BlockSpec((bb, npad), lambda i: (i, 0)),
        compiler_params=pltpu.CompilerParams(
            dimension_semantics=("parallel",)),             # batch blocks split across TCs (v7x)
        cost_estimate=pl.CostEstimate(flops=flops, transcendentals=0,
                                      bytes_accessed=bytes_accessed),
    )(state, action, wpacked, bpacked)


def mlp_critic_twin_forward(state, action, wpacked, bpacked, offs, *,
                            hp, npad, nclass):
    """Module-semantics API: returns (q1, q2), each [B, num_classes] f32.
    (Prefer the slab entry point + consumer-side split in fused pipelines.)"""
    out = mlp_critic_twin_forward_slab(state, action, wpacked, bpacked, offs,
                                       hp=hp, npad=npad)
    qcat = out[:, :2 * nclass]
    return qcat[:, :nclass], qcat[:, nclass:]


# ----------------------------------------------------------------------------- init / reference
def _init_linear(key, fan_in, fan_out):
    """nn.Linear default init (kaiming_uniform a=sqrt(5) -> U(+-1/sqrt(fan_in)))."""
    kw, kb = jax.random.split(key)
    bound = 1.0 / math.sqrt(fan_in)
    w = jax.random.uniform(kw, (fan_in, fan_out), jnp.float32, -bound, bound)
    b = jax.random.uniform(kb, (fan_out,), jnp.float32, -bound, bound)
    return w, b


def init_q_head(key, din, hidden, nclass):
    k1, k2, k3 = jax.random.split(key, 3)
    w1, b1 = _init_linear(k1, din, hidden)
    w2, b2 = _init_linear(k2, hidden, hidden)
    w3, b3 = _init_linear(k3, hidden, nclass)
    return (w1, b1, w2, b2, w3, b3)


def reference_forward(state, action, q1_params, q2_params, *, bf16_weights=False):
    x = jnp.concatenate([state, action], axis=-1)

    if bf16_weights:
        def mm(a, w):
            return jnp.dot(a.astype(jnp.bfloat16), w.astype(jnp.bfloat16),
                           preferred_element_type=jnp.float32)
    else:
        hi = jax.lax.Precision.HIGHEST
        def mm(a, w):
            return jnp.dot(a, w, precision=hi)

    def head(p):
        w1, b1, w2, b2, w3, b3 = p
        h = jax.nn.relu(mm(x, w1) + b1)
        h = jax.nn.relu(mm(h, w2) + b2)
        return mm(h, w3) + b3

    return head(q1_params), head(q2_params)


# ----------------------------------------------------------------------------- main
if __name__ == "__main__":
    # Small demo shapes (module structure: Linear(S+A,H)-ReLU-Linear(H,H)-ReLU-Linear(H,C) x2).
    # NOTE: at B=8 the kernel is pure fixed overhead; stack envs/timesteps so B is a
    # multiple of 128/256 per block to actually load the MXU (review item [5]).
    state_dim, action_dim, num_classes, hidden_dim = 16, 16, 3, 64
    batch = 8
    din = state_dim + action_dim

    key = jax.random.PRNGKey(0)
    kq1, kq2, ks, ka = jax.random.split(key, 4)
    q1_params = init_q_head(kq1, din, hidden_dim, num_classes)
    q2_params = init_q_head(kq2, din, hidden_dim, num_classes)
    state = jax.random.normal(ks, (batch, state_dim), jnp.float32)
    action = jax.random.normal(ka, (batch, action_dim), jnp.float32)

    wpacked, bpacked, offs, hp, npad = pack_twin_params(
        q1_params, q2_params, state_dim, action_dim, hidden_dim, num_classes)

    out = mlp_critic_twin_forward_slab(state, action, wpacked, bpacked, offs,
                                       hp=hp, npad=npad)
    out = jax.block_until_ready(out)

    # Consumer-side split of the lane-dense slab (review item [8]).
    q1 = np.asarray(out[:, :num_classes])
    q2 = np.asarray(out[:, num_classes:2 * num_classes])
    assert q1.shape == (batch, num_classes) and q2.shape == (batch, num_classes)

    # Tight check vs a reference with identical bf16-weight numerics.
    rb1, rb2 = reference_forward(state, action, q1_params, q2_params, bf16_weights=True)
    np.testing.assert_allclose(q1, np.asarray(rb1), rtol=2e-3, atol=2e-3)
    np.testing.assert_allclose(q2, np.asarray(rb2), rtol=2e-3, atol=2e-3)

    # Loose check vs the full-f32 module semantics (bf16 quantisation bound).
    rf1, rf2 = reference_forward(state, action, q1_params, q2_params, bf16_weights=False)
    np.testing.assert_allclose(q1, np.asarray(rf1), rtol=3e-2, atol=3e-2)
    np.testing.assert_allclose(q2, np.asarray(rf2), rtol=3e-2, atol=3e-2)

    print("KERNEL_OK")
</pallas_src>

<mosaic_0001>
module attributes {stable_mosaic.version = 11 : i64} {
  func.func @_twin_kernel(%arg0: i32, %arg1: memref<8x16xf32, #tpu.memory_space<vmem>>, %arg2: memref<8x16xf32, #tpu.memory_space<vmem>>, %arg3: memref<288x128xbf16, #tpu.memory_space<vmem>>, %arg4: memref<8x128xf32, #tpu.memory_space<vmem>>, %arg5: memref<8x128xf32, #tpu.memory_space<vmem>>) attributes {dimension_semantics = [#tpu.dimension_semantics<parallel>], iteration_bounds = array<i64: 1>, scalar_prefetch = 0 : i64, scratch_operands = 0 : i64, tpu.core_type = #tpu.core_type<tc>, window_params = [{transform_indices = @transform_0, window_bounds = array<i64: 8, 16>}, {transform_indices = @transform_1, window_bounds = array<i64: 8, 16>}, {pipeline_mode = #tpu.pipeline_mode<synchronous>, transform_indices = @transform_2, window_bounds = array<i64: 288, 128>}, {pipeline_mode = #tpu.pipeline_mode<synchronous>, transform_indices = @transform_3, window_bounds = array<i64: 8, 128>}, {transform_indices = @transform_4, window_bounds = array<i64: 8, 128>}]} {
    %c0 = arith.constant 0 : index
    %c0_0 = arith.constant 0 : index
    %0 = vector.load %arg1[%c0, %c0_0] : memref<8x16xf32, #tpu.memory_space<vmem>>, vector<8x16xf32>
    %1 = arith.truncf %0 : vector<8x16xf32> to vector<8x16xbf16>
    %c0_1 = arith.constant 0 : index
    %c0_2 = arith.constant 0 : index
    %2 = vector.load %arg2[%c0_1, %c0_2] : memref<8x16xf32, #tpu.memory_space<vmem>>, vector<8x16xf32>
    %3 = arith.truncf %2 : vector<8x16xf32> to vector<8x16xbf16>
    %c0_3 = arith.constant 0 : index
    %c0_4 = arith.constant 0 : index
    %4 = vector.load %arg3[%c0_3, %c0_4] : memref<288x128xbf16, #tpu.memory_space<vmem>>, vector<16x128xbf16>
    %cst = arith.constant dense<0.000000e+00> : vector<8x128xf32>
    %5 = tpu.matmul %1, %4, %cst {dimension_numbers = #tpu.dot_dimension_numbers<[1], [0], [0], [1], [0, 0, 1, 1], [], []>} : vector<8x16xbf16>, vector<16x128xbf16>, vector<8x128xf32> -> vector<8x128xf32>
    %c16 = arith.constant 16 : index
    %c0_5 = arith.constant 0 : index
    %6 = vector.load %arg3[%c16, %c0_5] : memref<288x128xbf16, #tpu.memory_space<vmem>>, vector<16x128xbf16>
    %cst_6 = arith.constant dense<0.000000e+00> : vector<8x128xf32>
    %7 = tpu.matmul %3, %6, %cst_6 {dimension_numbers = #tpu.dot_dimension_numbers<[1], [0], [0], [1], [0, 0, 1, 1], [], []>} : vector<8x16xbf16>, vector<16x128xbf16>, vector<8x128xf32> -> vector<8x128xf32>
    %8 = arith.addf %5, %7 : vector<8x128xf32>
    %c0_7 = arith.constant 0 : index
    %c0_8 = arith.constant 0 : index
    %9 = vector.load %arg4[%c0_7, %c0_8] : memref<8x128xf32, #tpu.memory_space<vmem>>, vector<1x128xf32>
    %10 = vector.broadcast %9 : vector<1x128xf32> to vector<8x128xf32>
    %11 = arith.addf %8, %10 : vector<8x128xf32>
    %cst_9 = arith.constant 0.000000e+00 : f32
    %12 = vector.broadcast %cst_9 : f32 to vector<8x128xf32>
    %13 = arith.maximumf %11, %12 : vector<8x128xf32>
    %14 = arith.truncf %13 : vector<8x128xf32> to vector<8x128xbf16>
    %c32 = arith.constant 32 : index
    %c0_10 = arith.constant 0 : index
    %15 = vector.load %arg3[%c32, %c0_10] : memref<288x128xbf16, #tpu.memory_space<vmem>>, vector<128x128xbf16>
    %cst_11 = arith.constant dense<0.000000e+00> : vector<8x128xf32>
    %16 = tpu.matmul %14, %15, %cst_11 {dimension_numbers = #tpu.dot_dimension_numbers<[1], [0], [0], [1], [0, 0, 1, 1], [], []>} : vector<8x128xbf16>, vector<128x128xbf16>, vector<8x128xf32> -> vector<8x128xf32>
    %c1 = arith.constant 1 : index
    %c0_12 = arith.constant 0 : index
    %17 = vector.load %arg4[%c1, %c0_12] : memref<8x128xf32, #tpu.memory_space<vmem>>, vector<1x128xf32>
    %18 = vector.broadcast %17 : vector<1x128xf32> to vector<8x128xf32>
    %19 = arith.addf %16, %18 : vector<8x128xf32>
    %cst_13 = arith.constant 0.000000e+00 : f32
    %20 = vector.broadcast %cst_13 : f32 to vector<8x128xf32>
    %21 = arith.maximumf %19, %20 : vector<8x128xf32>
    %22 = arith.truncf %21 : vector<8x128xf32> to vector<8x128xbf16>
    %c160 = arith.constant 160 : index
    %c0_14 = arith.constant 0 : index
    %23 = vector.load %arg3[%c160, %c0_14] : memref<288x128xbf16, #tpu.memory_space<vmem>>, vector<128x128xbf16>
    %cst_15 = arith.constant dense<0.000000e+00> : vector<8x128xf32>
    %24 = tpu.matmul %22, %23, %cst_15 {dimension_numbers = #tpu.dot_dimension_numbers<[1], [0], [0], [1], [0, 0, 1, 1], [], []>} : vector<8x128xbf16>, vector<128x128xbf16>, vector<8x128xf32> -> vector<8x128xf32>
    %c2 = arith.constant 2 : index
    %c0_16 = arith.constant 0 : index
    %25 = vector.load %arg4[%c2, %c0_16] : memref<8x128xf32, #tpu.memory_space<vmem>>, vector<1x128xf32>
    %26 = vector.broadcast %25 : vector<1x128xf32> to vector<8x128xf32>
    %27 = arith.addf %24, %26 : vector<8x128xf32>
    %c0_17 = arith.constant 0 : index
    %c0_18 = arith.constant 0 : index
    %28 = vector.load %arg5[%c0_17, %c0_18] : memref<8x128xf32, #tpu.memory_space<vmem>>, vector<8x128xf32>
    tpu.vector_store %arg5[%c0_17, %c0_18], %27 {strides = array<i32>} : memref<8x128xf32, #tpu.memory_space<vmem>>, vector<8x128xf32>,
    return
  }
  func.func @transform_0(%arg0: i32) -> (i32, i32) {
    %c0_i32 = arith.constant 0 : i32
    %c0_i32_0 = arith.constant 0 : i32
    return %arg0, %c0_i32 : i32, i32
  }
  func.func @transform_1(%arg0: i32) -> (i32, i32) {
    %c0_i32 = arith.constant 0 : i32
    %c0_i32_0 = arith.constant 0 : i32
    return %arg0, %c0_i32 : i32, i32
  }
  func.func @transform_2(%arg0: i32) -> (i32, i32) {
    %c0_i32 = arith.constant 0 : i32
    %c0_i32_0 = arith.constant 0 : i32
    %c0_i32_1 = arith.constant 0 : i32
    return %c0_i32, %c0_i32_0 : i32, i32
  }
  func.func @transform_3(%arg0: i32) -> (i32, i32) {
    %c0_i32 = arith.constant 0 : i32
    %c0_i32_0 = arith.constant 0 : i32
    %c0_i32_1 = arith.constant 0 : i32
    return %c0_i32, %c0_i32_0 : i32, i32
  }
  func.func @transform_4(%arg0: i32) -> (i32, i32) {
    %c0_i32 = arith.constant 0 : i32
    %c0_i32_0 = arith.constant 0 : i32
    return %arg0, %c0_i32 : i32, i32
  }
}

</mosaic_0001>

<bundles_post_ra>
// kernel: tpu_custom_call.1
= control target key start
LH: loop header
LB: loop body
LE: loop exit
PB: predicated region body
PF: predicated region fallthrough
CT: control target
= control target key end

     0   :  { %9 = vsyncpa [#allocation3], 0  ;;  %s741_s0 = inlined_call_operand.hbm [shape: f32[8,16], index: 0, kind: input, shape index: {}]   ;;  %s742_s1 = inlined_call_operand.hbm [shape: f32[8,16], index: 1, kind: input, shape index: {}]   ;;  %s743_s2 = inlined_call_operand.hbm [shape: bf16[288,128], index: 2, kind: input, shape index: {}]   ;;  %s744_s3 = inlined_call_operand.vmem [shape: f32[8,128], index: 3, kind: input, shape index: {}]   ;;  %s745_s4 = inlined_call_operand.hbm [shape: f32[8,128], index: 4, kind: output, shape index: {}]  }
   0x1   :  { %10 = vsyncpa [#allocation6], 0 }
   0x2   :  { %11 = vsyncpa [#allocation4], 0  ;;  %s625_s15 = smov [#allocation5]   ;;  %s626_s17 = smov [#allocation2]  }
   0x3   :  { %s28_s16 = sshll.u32 %s625_s15, 4  ;;  %s18_s18 = sshll.u32 %s626_s17, 4  ;;  %s29_s16 = int_to_ptr.vmem [resolvable:$true] %s28_s16  ;;  %s19_s18 = int_to_ptr.vmem [resolvable:$true] %s18_s18 }
   0x4   :  { %s531_s21 = scalar_lea.hbm %s742_s1, 128 }
   0x5   :  { %p532_p0 = scmp.ne.s32.totalorder %s742_s1, %s531_s21  ;;  %p535_p1 = scmp.lt.u32.totalorder %s531_s21, %s742_s1 }
   0x7   :  { %p537_p2 = pnand %p535_p1, %p532_p0 }
   0x9   :  { %540 = shalt.err (!%p537_p2)
}
   0xa   :  { %s541_s26 = scalar_lea.vmem %s29_s16, 128  ;;  %p546_p4 = scmp.lt.s32.totalorder %s29_s16, %s29_s16 }
   0xb   :  { %p542_p3 = scmp.ne.s32.totalorder %s29_s16, %s541_s26  ;;  %p547_p5 = scmp.lt.s32.totalorder %s541_s26, %s541_s26 }
   0xd   :  { %p548_p6 = por %p547_p5, %p546_p4 }
   0xf   :  { %p549_p7 = pnand %p548_p6, %p542_p3 }
  0x11   :  { %552 = shalt.err (!%p549_p7)
}
  0x12   :  { %31 = dma.hbm_to_vmem [thread:$0]  %s742_s1, 128, %s29_s16, [#allocation6]  }
  0x13   :  { %s553_s5 = scalar_lea.hbm %s741_s0, 128 }
  0x14   :  { %p554_p8 = scmp.ne.s32.totalorder %s741_s0, %s553_s5  ;;  %p557_p9 = scmp.lt.u32.totalorder %s553_s5, %s741_s0 }
  0x16   :  { %p559_p10 = pnand %p557_p9, %p554_p8 }
  0x18   :  { %562 = shalt.err (!%p559_p10)
}
  0x19   :  { %s563_s10 = scalar_lea.vmem %s19_s18, 128  ;;  %p568_p12 = scmp.lt.s32.totalorder %s19_s18, %s19_s18 }
  0x1a   :  { %p564_p11 = scmp.ne.s32.totalorder %s19_s18, %s563_s10  ;;  %p569_p13 = scmp.lt.s32.totalorder %s563_s10, %s563_s10 }
  0x1c   :  { %p570_p0 = por %p569_p13, %p568_p12 }
  0x1e   :  { %p571_p1 = pnand %p570_p0, %p564_p11 }
  0x20   :  { %574 = shalt.err (!%p571_p1)
}
  0x21   :  { %21 = dma.hbm_to_vmem [thread:$0]  %s741_s0, 128, %s19_s18, [#allocation3]  }
  0x22   :  { %s627_s12 = smov [#allocation7]   ;;  %s575_s16 = scalar_lea.hbm %s743_s2, 2304 }
  0x23   :  { %s37_s13 = sshll.u32 %s627_s12, 4  ;;  %p576_p2 = scmp.ne.s32.totalorder %s743_s2, %s575_s16  ;;  %s38_s13 = int_to_ptr.vmem [resolvable:$true] %s37_s13 }
  0x24   :  { %p579_p3 = scmp.lt.u32.totalorder %s575_s16, %s743_s2 }
  0x26   :  { %p581_p4 = pnand %p579_p3, %p576_p2 }
  0x28   :  { %584 = shalt.err (!%p581_p4)
}
  0x29   :  { %s585_s22 = scalar_lea.vmem %s38_s13, 2304  ;;  %p590_p6 = scmp.lt.s32.totalorder %s38_s13, %s38_s13 }
  0x2a   :  { %p586_p5 = scmp.ne.s32.totalorder %s38_s13, %s585_s22  ;;  %p591_p7 = scmp.lt.s32.totalorder %s585_s22, %s585_s22 }
  0x2c   :  { %p592_p8 = por %p591_p7, %p590_p6 }
  0x2e   :  { %p593_p9 = pnand %p592_p8, %p586_p5 }
  0x30   :  { %596 = shalt.err (!%p593_p9)
}
  0x31   :  { %s628_s0 = smov 64   ;;  %s629_s18 = smov 4  }
  0x32   :  { %43 = dma.hbm_to_vmem [thread:$0]  %s743_s2, 2304, %s38_s13, [#allocation6], %s628_s0, %s628_s0, %s629_s18  }
  0x33   :  { %619 = dma.done.wait [#allocation3], 128  }
  0x34   :  { %620 = vsyncadd [#allocation3], 4294967168 }
  0x35   :  { %621 = dma.done.wait [#allocation6], 2432  }
  0x36   :  { %622 = vsyncadd [#allocation6], 4294964864  ;;  %v630_v0 = vmov 0.0   ;;  %vm631_vm0 = vmmov 0   ;;  %v513_v1 = vld [vmem:[#allocation7 + $0x8] sm:$0xff]   ;;  %v514_v2 = vld [vmem:[#allocation7] sm:$0xff]  }
  0x37   :  { %453 = vmatprep.subr.bf16.mxu0 %v630_v0  ;;  %459 = vmatprep.subr.bf16.mxu1 %v630_v0  ;;  %v58_v3 = vld [vmem:[#allocation5] sm:$0xff]  ;;  %vm70_vm1 = vcmask 130048   ;;  %v56_v4 = vld [vmem:[#allocation2] sm:$0xff]  ;;  %v517_v9 = vld [vmem:[#allocation7 + $0x20] sm:$0xff]   ;;  %s632_s30 = smov [#allocation8]  }
  0x38   :  { %455 = vmatprep.mubr.msk.bf16.mxu0 %vm631_vm0, %v630_v0  ;;  %461 = vmatprep.mubr.msk.bf16.mxu1 %vm631_vm0, %v630_v0  ;;  %v59_v5 = vpack.c.bf16 %v58_v3, %v58_v3  ;;  %v57_v6 = vpack.c.bf16 %v56_v4, %v56_v4  ;;  %v515_v7 = vld [vmem:[#allocation7 + $0x10] sm:$0xff]   ;;  %v516_v8 = vld [vmem:[#allocation7 + $0x18] sm:$0xff]   ;;  %v518_v10 = vld [vmem:[#allocation7 + $0x28] sm:$0xff]   ;;  %s398_s5 = sshll.u32 %s632_s30, 4  ;;  %s399_s5 = int_to_ptr.vmem [resolvable:$true] %s398_s5 }
  0x39   :  { %454 = vmatpush3.bf16.msra.mxu0 %v513_v1  ;;  %460 = vmatpush3.bf16.msra.mxu1 %v514_v2  ;;  %v519_v11 = vld [vmem:[#allocation7 + $0x30] sm:$0xff]   ;;  %v520_v12 = vld [vmem:[#allocation7 + $0x38] sm:$0xff]   ;;  %v521_v13 = vld [vmem:[#allocation7 + $0x40] sm:$0xff]   ;;  %s597_s6 = scalar_lea.vmem %s399_s5, 128  ;;  %p602_p11 = scmp.lt.s32.totalorder %s399_s5, %s399_s5 }
  0x3a   :  { %465 = vmatprep.subr.bf16.mxu0 %v630_v0  ;;  %485 = vmatprep.subr.bf16.mxu1 %v630_v0  ;;  %v522_v14 = vld [vmem:[#allocation7 + $0x48] sm:$0xff]   ;;  %v523_v15 = vld [vmem:[#allocation7 + $0x50] sm:$0xff]   ;;  %v524_v16 = vld [vmem:[#allocation7 + $0x58] sm:$0xff]   ;;  %p598_p10 = scmp.ne.s32.totalorder %s399_s5, %s597_s6  ;;  %p603_p12 = scmp.lt.s32.totalorder %s597_s6, %s597_s6 }
  0x3b   :  { %v525_v17 = vld [vmem:[#allocation7 + $0x60] sm:$0xff]   ;;  %v526_v18 = vld [vmem:[#allocation7 + $0x68] sm:$0xff]   ;;  %v527_v19 = vld [vmem:[#allocation7 + $0x70] sm:$0xff]  }
  0x3c   :  { %456 = vmatmul.mubr.msk.bf16.vlgmr.msra.gmra.mrb[0].mxu0 %vm70_vm1, %v59_v5  ;;  %462 = vmatmul.mubr.msk.bf16.vlgmr.msra.gmra.mrb[0].mxu1 %vm70_vm1, %v57_v6  ;;  %v528_v20 = vld [vmem:[#allocation7 + $0x78] sm:$0xff]   ;;  %v412_v23 = vld [vmem:[%s744_s3] ss:$0 sm:$0xff]  ;;  %v529_v34 = vld [vmem:[#allocation7 + $0x80] sm:$0xff]   ;;  %p604_p13 = por %p603_p12, %p602_p11 }
  0x3d   :  { %466 = vmatpush3.bf16.msra.mxu0 %v515_v7  ;;  %481 = vmatprep.mubr.msk.bf16.mxu0 %vm631_vm0, %v630_v0  ;;  %v530_v35 = vld [vmem:[#allocation7 + $0x88] sm:$0xff]   ;;  %v413_v36 = vld [vmem:[%s744_s3 + $0x1] ss:$0 sm:$0xff]  ;;  %v422_v44 = vld [vmem:[%s744_s3 + $0x2] ss:$0 sm:$0xff] }
  0x3e   :  { %467 = vmatprep.subr.bf16.mxu0 %v630_v0  ;;  %501 = vmatprep.mubr.msk.bf16.mxu1 %vm631_vm0, %v630_v0  ;;  %p605_p0 = pnand %p604_p13, %p598_p10 }
  0x3f   :  { %486 = vmatpush3.bf16.msra.mxu1 %v523_v15 }
  0x40   :  { %487 = vmatprep.subr.bf16.mxu1 %v630_v0 }
  0x41   :  { %468 = vmatpush3.bf16.msra.mxu0 %v516_v8 }
  0x42   :  { %469 = vmatprep.subr.bf16.mxu0 %v630_v0 }
  0x43   :  { %488 = vmatpush3.bf16.msra.mxu1 %v524_v16 }
  0x44   :  { %489 = vmatprep.subr.bf16.mxu1 %v630_v0 }
  0x45   :  { %470 = vmatpush3.bf16.msra.mxu0 %v517_v9 }
  0x46   :  { %471 = vmatprep.subr.bf16.mxu0 %v630_v0 }
  0x47   :  { %490 = vmatpush3.bf16.msra.mxu1 %v525_v17 }
  0x48   :  { %491 = vmatprep.subr.bf16.mxu1 %v630_v0 }
  0x49   :  { %472 = vmatpush3.bf16.msra.mxu0 %v518_v10 }
  0x4a   :  { %473 = vmatprep.subr.bf16.mxu0 %v630_v0 }
  0x4b   :  { %492 = vmatpush3.bf16.msra.mxu1 %v526_v18 }
  0x4c   :  { %493 = vmatprep.subr.bf16.mxu1 %v630_v0 }
  0x4d   :  { %474 = vmatpush3.bf16.msra.mxu0 %v519_v11 }
  0x4e   :  { %475 = vmatprep.subr.bf16.mxu0 %v630_v0 }
  0x4f   :  { %494 = vmatpush3.bf16.msra.mxu1 %v527_v19 }
  0x50   :  { %495 = vmatprep.subr.bf16.mxu1 %v630_v0 }
  0x51   :  { %476 = vmatpush3.bf16.msra.mxu0 %v520_v12 }
  0x52   :  { %477 = vmatprep.subr.bf16.mxu0 %v630_v0 }
  0x53   :  { %496 = vmatpush3.bf16.msra.mxu1 %v528_v20 }
  0x54   :  { %497 = vmatprep.subr.bf16.mxu1 %v630_v0 }
  0x55   :  { %478 = vmatpush3.bf16.msra.mxu0 %v521_v13 }
  0x56   :  { %479 = vmatprep.subr.bf16.mxu0 %v630_v0 }
  0x57   :  { %498 = vmatpush3.bf16.msra.mxu1 %v529_v34 }
  0x58   :  { %499 = vmatprep.subr.bf16.mxu1 %v630_v0 }
  0x59   :  { %480 = vmatpush3.bf16.msra.mxu0 %v522_v14 }
  0x5b   :  { %500 = vmatpush3.bf16.msra.mxu1 %v530_v35 }
 0x10f   :  { %v108_v21 = vpop.f32.mrb[0].mxu0  ;;  %v157_v22 = vpop.f32.mrb[0].mxu1 }
 0x110   :  { %v457_v24 = vpop.f32.mrb[1].mxu0  ;;  %v158_v25 = vadd.f32 %v157_v22, %v108_v21  ;;  %v463_v26 = vpop.f32.mrb[1].mxu1 }
 0x111   :  { %v111_v27 = vpop.f32.mrb[2].mxu0  ;;  %v160_v28 = vpop.f32.mrb[2].mxu1 }
 0x112   :  { %v458_v29 = vpop.f32.mrb[3].mxu0  ;;  %v168_v30 = vadd.f32 %v412_v23, %v158_v25  ;;  %v464_v31 = vpop.f32.mrb[3].mxu1 }
 0x114   :  { %v169_v32 = vmax.f32 %v168_v30, 0.0 }
 0x116   :  { %v170_v33 = vpack.c.bf16 %v169_v32, %v169_v32 }
 0x118   :  { %482 = vmatmul.mubr.bf16.vlgmr.msra.gmra.mrb[4].mxu0 %v170_v33 }
 0x1eb   :  { %v274_v37 = vpop.f32.mrb[4].mxu0 }
 0x1ec   :  { %v275_v38 = vadd.f32 %v413_v36, %v274_v37  ;;  %v483_v39 = vpop.f32.mrb[5].mxu0 }
 0x1ed   :  { %v277_v40 = vpop.f32.mrb[6].mxu0 }
 0x1ee   :  { %v280_v41 = vmax.f32 %v275_v38, 0.0  ;;  %v484_v42 = vpop.f32.mrb[7].mxu0 }
 0x1f0   :  { %v281_v43 = vpack.c.bf16 %v280_v41, %v280_v41 }
 0x1f2   :  { %502 = vmatmul.mubr.bf16.vlgmr.msra.gmra.mrb[4].mxu1 %v281_v43 }
 0x2c5   :  { %v385_v45 = vpop.f32.mrb[4].mxu1 }
 0x2c6   :  { %v386_v46 = vadd.f32 %v422_v44, %v385_v45  ;;  %v503_v47 = vpop.f32.mrb[5].mxu1 }
 0x2c7   :  { %v388_v48 = vpop.f32.mrb[6].mxu1 }
 0x2c8   :  { %391 = vst [vmem:[#allocation8] sm:$0xff] %v386_v46  ;;  %v504_v49 = vpop.f32.mrb[7].mxu1 }
 0x2c9   :  { %608 = shalt.err (!%p605_p0)
}
 0x2ca   :  { %s609_s3 = scalar_lea.hbm %s745_s4, 128 }
 0x2cb   :  { %p610_p1 = scmp.ne.s32.totalorder %s745_s4, %s609_s3  ;;  %p613_p2 = scmp.lt.u32.totalorder %s609_s3, %s745_s4 }
 0x2cd   :  { %p615_p3 = pnand %p613_p2, %p610_p1 }
 0x2cf   :  { %618 = shalt.err (!%p615_p3)
}
 0x2d0   :  { %401 = dma.vmem_to_hbm [thread:$0]  %s399_s5, 128, %s745_s4, [#allocation4]  }
 0x2d1   :  { %623 = dma.done.wait [#allocation4], 128  }
 0x2d2   :  { %624 = vsyncadd [#allocation4], 4294967168 }
 0x2d3   :  { %405 = vsyncpa [#allocation3], 1 }
 0x2d4   :  { %406 = vsyncpa [#allocation6], 1 }
 0x2d5   :  { %407 = vsyncpa [#allocation4], 1 }

</bundles_post_ra>
